<compile_context>
chip_gen: v7x
topology: tpu7x:2x2x1
jax: 0.10.0
libtpu: 0.0.40
codegen_flags: <defaults>
</compile_context>

<pallas_src>
import functools

import jax
import jax.numpy as jnp
from jax.experimental import pallas as pl
from jax.experimental.pallas import tpu as pltpu  # noqa: F401  (TPU backend)

EPS = 1e-5
_LANES = 128
_SUBLANES = 8

# Order of the 1-D parameter vectors inside the packed slab (one row each).
_VEC_FIELDS = ("g0", "b0", "bias1", "g1", "be1", "bias2", "w3", "bias3")


def _round_up(x, m):
    return ((x + m - 1) // m) * m


def _param_layout(state_size, action_size, fcs1_units, fc2_units):
    """Row/column layout of the single packed parameter slab.

    Rows (sublane axis), every segment's row-start 8-aligned:
      [r_w1 : r_w1 + S)          -> W1^T          (S      x F1)
      [r_w2 : r_w2 + F1 + A)     -> W2^T          ((F1+A) x F2)  (cat weight)
      row vec_rows[name]         -> 1-D parameter `name` in cols [0:width)
    Columns padded to a multiple of 128 lanes.
    """
    S, A, F1, F2 = state_size, action_size, fcs1_units, fc2_units
    widths = {"g0": S, "b0": S, "bias1": F1, "g1": F1, "be1": F1,
              "bias2": F2, "w3": F2, "bias3": 1}
    C = _round_up(max(F1, F2, max(widths.values())), _LANES)
    r_w1 = 0
    r_w2 = r_w1 + _round_up(S, _SUBLANES)
    r_vec = r_w2 + _round_up(F1 + A, _SUBLANES)
    vec_rows = {name: r_vec + i for i, name in enumerate(_VEC_FIELDS)}
    R = r_vec + _round_up(len(_VEC_FIELDS), _SUBLANES)
    # Segment row-starts must stay sublane-tile aligned so the in-kernel row
    # slices remain free views (no VMEM copies) on every TPU generation.
    assert r_w1 % _SUBLANES == 0 and r_w2 % _SUBLANES == 0
    assert r_vec % _SUBLANES == 0
    return dict(R=R, C=C, r_w1=r_w1, r_w2=r_w2, vec_rows=vec_rows,
                widths=widths)


def critic_kernel(x_ref, p_ref, out_ref, *, dims, layout):
    S, A, F1, F2 = dims
    r_w1, r_w2 = layout["r_w1"], layout["r_w2"]
    vec_rows, widths = layout["vec_rows"], layout["widths"]

    def vec(name):
        r = vec_rows[name]                       # static, 1 row per field
        return p_ref[r:r + 1, 0:widths[name]]    # (1, width) view-load

    x = x_ref[...].astype(jnp.float32)           # (B, S + A)
    s = x[:, 0:S]                                # state columns
    a = x[:, S:S + A]                            # action columns
    inv_b = 1.0 / x.shape[0]                     # static batch size

    # --- bn0(state): training-mode BatchNorm1d, two-pass batch statistics ---
    mu0 = jnp.sum(s, axis=0, keepdims=True) * inv_b
    d0 = s - mu0
    var0 = jnp.sum(d0 * d0, axis=0, keepdims=True) * inv_b   # biased variance
    xs = d0 * jax.lax.rsqrt(var0 + EPS) * vec("g0") + vec("b0")

    # --- fcs1 -> bn1 -> relu ---
    w1 = p_ref[r_w1:r_w1 + S, 0:F1]              # (S, F1) slab slice
    h1 = jnp.dot(xs, w1, preferred_element_type=jnp.float32) + vec("bias1")
    mu1 = jnp.sum(h1, axis=0, keepdims=True) * inv_b
    d1 = h1 - mu1
    var1 = jnp.sum(d1 * d1, axis=0, keepdims=True) * inv_b
    h1 = d1 * jax.lax.rsqrt(var1 + EPS) * vec("g1") + vec("be1")
    xs1 = jnp.maximum(h1, 0.0)

    # --- fc2 over cat(xs1, action): ONE MXU dot against the resident slab ---
    lhs2 = jnp.concatenate([xs1, a], axis=1)     # (B, F1 + A)
    w2 = p_ref[r_w2:r_w2 + F1 + A, 0:F2]         # (F1 + A, F2) slab slice
    h2 = jnp.dot(lhs2, w2, preferred_element_type=jnp.float32) + vec("bias2")
    h2 = jnp.maximum(h2, 0.0)

    # --- fc3 (output width 1): VPU multiply + lane reduce, no MXU trip ---
    q = jnp.sum(h2 * vec("w3"), axis=-1, keepdims=True) + vec("bias3")
    out_ref[...] = q.astype(out_ref.dtype)


@functools.partial(jax.jit, static_argnames=("dims",))
def critic_forward(x_packed, param_slab, *, dims):
    """x_packed: (B, S+A) = [state | action]; param_slab: packed parameters."""
    B = x_packed.shape[0]
    layout = _param_layout(*dims)
    kernel = functools.partial(critic_kernel, dims=dims, layout=layout)
    # Grid-less call: everything fits in VMEM, so skip the grid/pipeline
    # machinery and per-input index_maps entirely (two inputs, one output).
    return pl.pallas_call(
        kernel,
        out_shape=jax.ShapeDtypeStruct((B, 1), jnp.float32),
    )(x_packed, param_slab)


def init_params(key, state_size, action_size, fcs1_units, fc2_units):
    """Deterministic init mirroring Critic.__init__ / reset_parameters.

    get_range() uses weight.size()[0] == out_features, so the uniform limits
    are 1/sqrt(fcs1_units) and 1/sqrt(fc2_units); fc3 weights are +-0.003.
    Linear biases keep torch's default +-1/sqrt(fan_in) init.  Fresh
    BatchNorm1d layers have gamma=1, beta=0.
    """
    ks = jax.random.split(key, 6)
    f32 = jnp.float32

    g0 = jnp.ones((state_size,), f32)
    b0 = jnp.zeros((state_size,), f32)
    g1 = jnp.ones((fcs1_units,), f32)
    be1 = jnp.zeros((fcs1_units,), f32)

    lim1 = 1.0 / fcs1_units ** 0.5
    lim2 = 1.0 / fc2_units ** 0.5
    lim_b1 = 1.0 / state_size ** 0.5
    fan_in2 = fcs1_units + action_size
    lim_b2 = 1.0 / fan_in2 ** 0.5
    lim_b3 = 1.0 / fc2_units ** 0.5

    w1 = jax.random.uniform(ks[0], (fcs1_units, state_size), f32, -lim1, lim1)
    bias1 = jax.random.uniform(ks[1], (fcs1_units,), f32, -lim_b1, lim_b1)
    w2 = jax.random.uniform(ks[2], (fc2_units, fan_in2), f32, -lim2, lim2)
    bias2 = jax.random.uniform(ks[3], (fc2_units,), f32, -lim_b2, lim_b2)
    w3 = jax.random.uniform(ks[4], (1, fc2_units), f32, -0.003, 0.003)
    bias3 = jax.random.uniform(ks[5], (1,), f32, -lim_b3, lim_b3)

    return dict(g0=g0, b0=b0, w1=w1, bias1=bias1, g1=g1, be1=be1, w2=w2,
                bias2=bias2, w3=w3, bias3=bias3,
                state_size=state_size, action_size=action_size,
                fcs1_units=fcs1_units, fc2_units=fc2_units)


def pack_params(p):
    """Pack all parameters into a single lane/sublane-padded slab."""
    S, A = p["state_size"], p["action_size"]
    F1, F2 = p["fcs1_units"], p["fc2_units"]
    lay = _param_layout(S, A, F1, F2)
    slab = jnp.zeros((lay["R"], lay["C"]), jnp.float32)
    slab = slab.at[lay["r_w1"]:lay["r_w1"] + S, 0:F1].set(
        p["w1"].T.astype(jnp.float32))
    slab = slab.at[lay["r_w2"]:lay["r_w2"] + F1 + A, 0:F2].set(
        p["w2"].T.astype(jnp.float32))
    vecs = {"g0": p["g0"], "b0": p["b0"], "bias1": p["bias1"], "g1": p["g1"],
            "be1": p["be1"], "bias2": p["bias2"], "w3": p["w3"].reshape(-1),
            "bias3": p["bias3"]}
    for name in _VEC_FIELDS:
        r = lay["vec_rows"][name]
        v = vecs[name].astype(jnp.float32)
        slab = slab.at[r, 0:v.shape[0]].set(v)
    return slab


def pack_inputs(state, action):
    """Pack state and action into one (B, S+A) activation tile."""
    return jnp.concatenate(
        [state.astype(jnp.float32), action.astype(jnp.float32)], axis=1)


def critic_reference(state, action, p):
    """Pure-JAX reference of the same forward pass (training-mode BN)."""
    s = state.astype(jnp.float32)
    mu0 = jnp.mean(s, axis=0, keepdims=True)
    var0 = jnp.mean((s - mu0) ** 2, axis=0, keepdims=True)
    xs = (s - mu0) / jnp.sqrt(var0 + EPS) * p["g0"] + p["b0"]
    h1 = xs @ p["w1"].T + p["bias1"]
    mu1 = jnp.mean(h1, axis=0, keepdims=True)
    var1 = jnp.mean((h1 - mu1) ** 2, axis=0, keepdims=True)
    xs1 = jnp.maximum((h1 - mu1) / jnp.sqrt(var1 + EPS) * p["g1"] + p["be1"],
                      0.0)
    x = jnp.concatenate([xs1, action.astype(jnp.float32)], axis=1)
    h2 = jnp.maximum(x @ p["w2"].T + p["bias2"], 0.0)
    return h2 @ p["w3"].T + p["bias3"]


if __name__ == "__main__":
    # Small shapes consistent with the module's forward pass.
    batch, state_size, action_size = 8, 16, 8
    fcs1_units, fc2_units = 64, 32

    key = jax.random.PRNGKey(0)
    k_state, k_action, k_params = jax.random.split(key, 3)

    state = jax.random.normal(k_state, (batch, state_size), jnp.float32)
    action = jax.random.normal(k_action, (batch, action_size), jnp.float32)
    params = init_params(k_params, state_size, action_size,
                         fcs1_units, fc2_units)

    x_packed = pack_inputs(state, action)
    param_slab = pack_params(params)
    dims = (state_size, action_size, fcs1_units, fc2_units)

    q = critic_forward(x_packed, param_slab, dims=dims)
    jax.block_until_ready(q)

    q_ref = critic_reference(state, action, params)
    assert q.shape == (batch, 1), q.shape
    assert jnp.allclose(q, q_ref, atol=1e-4, rtol=1e-4), (q, q_ref)

    print("KERNEL_OK")
</pallas_src>

<mosaic_0001>
module attributes {stable_mosaic.version = 11 : i64} {
  func.func @critic_kernel(%arg0: memref<8x24xf32, #tpu.memory_space<vmem>>, %arg1: memref<96x128xf32, #tpu.memory_space<vmem>>, %arg2: memref<8x1xf32, #tpu.memory_space<vmem>>) attributes {dimension_semantics = [], scalar_prefetch = 0 : i64, scratch_operands = 0 : i64, tpu.core_type = #tpu.core_type<tc>} {
    %c0 = arith.constant 0 : index
    %c0_0 = arith.constant 0 : index
    %0 = vector.load %arg0[%c0, %c0_0] : memref<8x24xf32, #tpu.memory_space<vmem>>, vector<8x24xf32>
    %1 = vector.extract_strided_slice %0 {offsets = [0, 0], sizes = [8, 16], strides = [1, 1]} : vector<8x24xf32> to vector<8x16xf32>
    %2 = vector.extract_strided_slice %0 {offsets = [0, 16], sizes = [8, 8], strides = [1, 1]} : vector<8x24xf32> to vector<8x8xf32>
    %cst = arith.constant dense<0.000000e+00> : vector<16xf32>
    %3 = vector.multi_reduction <add>, %1, %cst [0] : vector<8x16xf32> to vector<16xf32>
    %4 = vector.shape_cast %3 : vector<16xf32> to vector<1x16xf32>
    %cst_1 = arith.constant 1.250000e-01 : f32
    %5 = vector.broadcast %cst_1 : f32 to vector<1x16xf32>
    %6 = arith.mulf %4, %5 : vector<1x16xf32>
    %7 = vector.broadcast %6 : vector<1x16xf32> to vector<8x16xf32>
    %8 = arith.subf %1, %7 : vector<8x16xf32>
    %9 = arith.mulf %8, %8 : vector<8x16xf32>
    %cst_2 = arith.constant dense<0.000000e+00> : vector<16xf32>
    %10 = vector.multi_reduction <add>, %9, %cst_2 [0] : vector<8x16xf32> to vector<16xf32>
    %11 = vector.shape_cast %10 : vector<16xf32> to vector<1x16xf32>
    %cst_3 = arith.constant 1.250000e-01 : f32
    %12 = vector.broadcast %cst_3 : f32 to vector<1x16xf32>
    %13 = arith.mulf %11, %12 : vector<1x16xf32>
    %cst_4 = arith.constant 9.99999974E-6 : f32
    %14 = vector.broadcast %cst_4 : f32 to vector<1x16xf32>
    %15 = arith.addf %13, %14 : vector<1x16xf32>
    %16 = math.rsqrt %15 : vector<1x16xf32>
    %17 = vector.broadcast %16 : vector<1x16xf32> to vector<8x16xf32>
    %18 = arith.mulf %8, %17 : vector<8x16xf32>
    %c88 = arith.constant 88 : index
    %c0_5 = arith.constant 0 : index
    %19 = vector.load %arg1[%c88, %c0_5] : memref<96x128xf32, #tpu.memory_space<vmem>>, vector<1x16xf32>
    %20 = vector.broadcast %19 : vector<1x16xf32> to vector<8x16xf32>
    %21 = arith.mulf %18, %20 : vector<8x16xf32>
    %c89 = arith.constant 89 : index
    %c0_6 = arith.constant 0 : index
    %22 = vector.load %arg1[%c89, %c0_6] : memref<96x128xf32, #tpu.memory_space<vmem>>, vector<1x16xf32>
    %23 = vector.broadcast %22 : vector<1x16xf32> to vector<8x16xf32>
    %24 = arith.addf %21, %23 : vector<8x16xf32>
    %c0_7 = arith.constant 0 : index
    %c0_8 = arith.constant 0 : index
    %25 = vector.load %arg1[%c0_7, %c0_8] : memref<96x128xf32, #tpu.memory_space<vmem>>, vector<16x64xf32>
    %cst_9 = arith.constant dense<0.000000e+00> : vector<8x64xf32>
    %26 = tpu.matmul %24, %25, %cst_9 {dimension_numbers = #tpu.dot_dimension_numbers<[1], [0], [0], [1], [0, 0, 1, 1], [], []>} : vector<8x16xf32>, vector<16x64xf32>, vector<8x64xf32> -> vector<8x64xf32>
    %c90 = arith.constant 90 : index
    %c0_10 = arith.constant 0 : index
    %27 = vector.load %arg1[%c90, %c0_10] : memref<96x128xf32, #tpu.memory_space<vmem>>, vector<1x64xf32>
    %28 = vector.broadcast %27 : vector<1x64xf32> to vector<8x64xf32>
    %29 = arith.addf %26, %28 : vector<8x64xf32>
    %cst_11 = arith.constant dense<0.000000e+00> : vector<64xf32>
    %30 = vector.multi_reduction <add>, %29, %cst_11 [0] : vector<8x64xf32> to vector<64xf32>
    %31 = vector.shape_cast %30 : vector<64xf32> to vector<1x64xf32>
    %cst_12 = arith.constant 1.250000e-01 : f32
    %32 = vector.broadcast %cst_12 : f32 to vector<1x64xf32>
    %33 = arith.mulf %31, %32 : vector<1x64xf32>
    %34 = vector.broadcast %33 : vector<1x64xf32> to vector<8x64xf32>
    %35 = arith.subf %29, %34 : vector<8x64xf32>
    %36 = arith.mulf %35, %35 : vector<8x64xf32>
    %cst_13 = arith.constant dense<0.000000e+00> : vector<64xf32>
    %37 = vector.multi_reduction <add>, %36, %cst_13 [0] : vector<8x64xf32> to vector<64xf32>
    %38 = vector.shape_cast %37 : vector<64xf32> to vector<1x64xf32>
    %cst_14 = arith.constant 1.250000e-01 : f32
    %39 = vector.broadcast %cst_14 : f32 to vector<1x64xf32>
    %40 = arith.mulf %38, %39 : vector<1x64xf32>
    %cst_15 = arith.constant 9.99999974E-6 : f32
    %41 = vector.broadcast %cst_15 : f32 to vector<1x64xf32>
    %42 = arith.addf %40, %41 : vector<1x64xf32>
    %43 = math.rsqrt %42 : vector<1x64xf32>
    %44 = vector.broadcast %43 : vector<1x64xf32> to vector<8x64xf32>
    %45 = arith.mulf %35, %44 : vector<8x64xf32>
    %c91 = arith.constant 91 : index
    %c0_16 = arith.constant 0 : index
    %46 = vector.load %arg1[%c91, %c0_16] : memref<96x128xf32, #tpu.memory_space<vmem>>, vector<1x64xf32>
    %47 = vector.broadcast %46 : vector<1x64xf32> to vector<8x64xf32>
    %48 = arith.mulf %45, %47 : vector<8x64xf32>
    %c92 = arith.constant 92 : index
    %c0_17 = arith.constant 0 : index
    %49 = vector.load %arg1[%c92, %c0_17] : memref<96x128xf32, #tpu.memory_space<vmem>>, vector<1x64xf32>
    %50 = vector.broadcast %49 : vector<1x64xf32> to vector<8x64xf32>
    %51 = arith.addf %48, %50 : vector<8x64xf32>
    %cst_18 = arith.constant 0.000000e+00 : f32
    %52 = vector.broadcast %cst_18 : f32 to vector<8x64xf32>
    %53 = arith.maximumf %51, %52 : vector<8x64xf32>
    %54 = tpu.concatenate %53, %2 in 1 : vector<8x64xf32>, vector<8x8xf32> -> vector<8x72xf32>
    %c16 = arith.constant 16 : index
    %c0_19 = arith.constant 0 : index
    %55 = vector.load %arg1[%c16, %c0_19] : memref<96x128xf32, #tpu.memory_space<vmem>>, vector<72x32xf32>
    %cst_20 = arith.constant dense<0.000000e+00> : vector<8x32xf32>
    %56 = tpu.matmul %54, %55, %cst_20 {dimension_numbers = #tpu.dot_dimension_numbers<[1], [0], [0], [1], [0, 0, 1, 1], [], []>} : vector<8x72xf32>, vector<72x32xf32>, vector<8x32xf32> -> vector<8x32xf32>
    %c93 = arith.constant 93 : index
    %c0_21 = arith.constant 0 : index
    %57 = vector.load %arg1[%c93, %c0_21] : memref<96x128xf32, #tpu.memory_space<vmem>>, vector<1x32xf32>
    %58 = vector.broadcast %57 : vector<1x32xf32> to vector<8x32xf32>
    %59 = arith.addf %56, %58 : vector<8x32xf32>
    %cst_22 = arith.constant 0.000000e+00 : f32
    %60 = vector.broadcast %cst_22 : f32 to vector<8x32xf32>
    %61 = arith.maximumf %59, %60 : vector<8x32xf32>
    %c94 = arith.constant 94 : index
    %c0_23 = arith.constant 0 : index
    %62 = vector.load %arg1[%c94, %c0_23] : memref<96x128xf32, #tpu.memory_space<vmem>>, vector<1x32xf32>
    %63 = vector.broadcast %62 : vector<1x32xf32> to vector<8x32xf32>
    %64 = arith.mulf %61, %63 : vector<8x32xf32>
    %cst_24 = arith.constant dense<0.000000e+00> : vector<8xf32>
    %65 = vector.multi_reduction <add>, %64, %cst_24 [1] : vector<8x32xf32> to vector<8xf32>
    %66 = vector.shape_cast %65 : vector<8xf32> to vector<8x1xf32>
    %c95 = arith.constant 95 : index
    %c0_25 = arith.constant 0 : index
    %67 = vector.load %arg1[%c95, %c0_25] : memref<96x128xf32, #tpu.memory_space<vmem>>, vector<1x1xf32>
    %68 = vector.broadcast %67 : vector<1x1xf32> to vector<8x1xf32>
    %69 = arith.addf %66, %68 : vector<8x1xf32>
    %c0_26 = arith.constant 0 : index
    %c0_27 = arith.constant 0 : index
    %70 = vector.load %arg2[%c0_26, %c0_27] : memref<8x1xf32, #tpu.memory_space<vmem>>, vector<8x1xf32>
    tpu.vector_store %arg2[%c0_26, %c0_27], %69 {strides = array<i32>} : memref<8x1xf32, #tpu.memory_space<vmem>>, vector<8x1xf32>,
    return
  }
}

</mosaic_0001>

<bundles_post_ra>
// kernel: critic_forward.1
= control target key start
LH: loop header
LB: loop body
LE: loop exit
PB: predicated region body
PF: predicated region fallthrough
CT: control target
= control target key end

     0   :  { %7 = vsyncpa [#allocation3], 0  ;;  %s494_s0 = inlined_call_operand.hbm [shape: f32[8,24], index: 0, kind: input, shape index: {}]   ;;  %s495_s1 = inlined_call_operand.hbm [shape: f32[96,128], index: 1, kind: input, shape index: {}]   ;;  %s496_s2 = inlined_call_operand.vmem [shape: f32[8,1], index: 2, kind: output, shape index: {}]  }
   0x1   :  { %8 = vsyncpa [#allocation5], 0  ;;  %s431_s9 = smov [#allocation2]   ;;  %s432_s11 = smov [#allocation4]  }
   0x2   :  { %s15_s10 = sshll.u32 %s431_s9, 4  ;;  %s24_s12 = sshll.u32 %s432_s11, 4  ;;  %s16_s10 = int_to_ptr.vmem [resolvable:$true] %s15_s10  ;;  %s454_s12 = int_to_ptr.vmem [resolvable:$true] %s24_s12 }
   0x3   :  { %s383_s15 = scalar_lea.hbm %s494_s0, 128 }
   0x4   :  { %p384_p0 = scmp.ne.s32.totalorder %s494_s0, %s383_s15  ;;  %p387_p1 = scmp.lt.u32.totalorder %s383_s15, %s494_s0 }
   0x6   :  { %p389_p2 = pnand %p387_p1, %p384_p0 }
   0x8   :  { %392 = shalt.err (!%p389_p2)
}
   0x9   :  { %s393_s20 = scalar_lea.vmem %s16_s10, 128  ;;  %p398_p4 = scmp.lt.s32.totalorder %s16_s10, %s16_s10 }
   0xa   :  { %p394_p3 = scmp.ne.s32.totalorder %s16_s10, %s393_s20  ;;  %p399_p5 = scmp.lt.s32.totalorder %s393_s20, %s393_s20 }
   0xc   :  { %p400_p6 = por %p399_p5, %p398_p4 }
   0xe   :  { %p401_p7 = pnand %p400_p6, %p394_p3 }
  0x10   :  { %404 = shalt.err (!%p401_p7)
}
  0x11   :  { %18 = dma.hbm_to_vmem [thread:$0]  %s494_s0, 128, %s16_s10, [#allocation3]  }
  0x12   :  { %s405_s25 = scalar_lea.hbm %s495_s1, 1536 }
  0x13   :  { %p406_p8 = scmp.ne.s32.totalorder %s495_s1, %s405_s25  ;;  %p409_p9 = scmp.lt.u32.totalorder %s405_s25, %s495_s1 }
  0x15   :  { %p411_p10 = pnand %p409_p9, %p406_p8 }
  0x17   :  { %414 = shalt.err (!%p411_p10)
}
  0x18   :  { %s415_s30 = scalar_lea.vmem %s454_s12, 1536  ;;  %p420_p12 = scmp.lt.s32.totalorder %s454_s12, %s454_s12 }
  0x19   :  { %p416_p11 = scmp.ne.s32.totalorder %s454_s12, %s415_s30  ;;  %p421_p13 = scmp.lt.s32.totalorder %s415_s30, %s415_s30 }
  0x1b   :  { %p422_p0 = por %p421_p13, %p420_p12 }
  0x1d   :  { %p423_p1 = pnand %p422_p0, %p416_p11 }
  0x1f   :  { %426 = shalt.err (!%p423_p1)
}
  0x20   :  { %s433_s0 = smov 128   ;;  %s434_s3 = smov 8  }
  0x21   :  { %30 = dma.hbm_to_vmem [thread:$0]  %s495_s1, 1536, %s454_s12, [#allocation5], %s433_s0, %s433_s0, %s434_s3  }
  0x22   :  { %427 = dma.done.wait [#allocation3], 128  }
  0x23   :  { %428 = vsyncadd [#allocation3], 4294967168 }
  0x24   :  { %429 = dma.done.wait [#allocation5], 1536  }
  0x25   :  { %430 = vsyncadd [#allocation5], 4294965760  ;;  %v435_v0 = vmov 0.0|0.0   ;;  %vm436_vm0 = vmmov 0   ;;  %v437_v1 = vmov 0.0   ;;  %vm38_vm1 = vcmask 130048  }
  0x26   :  { %356 = vmatprep.subr.bf16.mxu0 %v435_v0  ;;  %332 = vmatprep.mubr.msk.f32.mxu0 %vm436_vm0, %v437_v1  ;;  %v72_v2 = vld [vmem:[#allocation4] sm:$0xff]  ;;  %v73_v3 = vld [vmem:[#allocation4 + $0x8] sm:$0xff]  ;;  %v37_v4 = vld [vmem:[#allocation2] sm:$0xff]  ;;  %s438_s6 = smov 48   ;;  %vm152_vm2 = vcmask 523264   ;;  %vm206_vm3 = vcmask 588800  }
  0x27   :  { %359 = vmatprep.subr.bf16.mxu1 %v435_v0  ;;  %353 = vmatprep.mubr.msk.f32.mxu1 %vm436_vm0, %v437_v1  ;;  %v357_v5 = vpack.c.bf16 %v73_v3, %v72_v2  ;;  %v39_v6 = vsel %vm38_vm1, %v37_v4, 0.0  ;;  %v305_v26 = vld [vmem:[#allocation4 + $0x58] ss:$0 sm:$0xff]  ;;  %v306_v28 = vld [vmem:[#allocation4 + $0x59] ss:$0 sm:$0xff]  ;;  %v192_v31 = vld [vmem:[#allocation4 + $0x10] sm:$0xff] }
  0x28   :  { %188 = vrot.lane.b32.xlu0 %v37_v4, %s438_s6  ;;  %v40_v7 = vrot.slane %v39_v6, 4  ;;  %v193_v32 = vld [vmem:[#allocation4 + $0x18] sm:$0xff]  ;;  %v194_v34 = vld [vmem:[#allocation4 + $0x20] sm:$0xff]  ;;  %v195_v35 = vld [vmem:[#allocation4 + $0x28] sm:$0xff]  ;;  %vm287_vm4 = vcmask 261120   ;;  %vm297_vm5 = vcmask 7168  }
  0x29   :  { %358 = vmatpush3.bf16.msra.mxu0 %v357_v5  ;;  %v360_v33 = vpack.c.bf16 %v193_v32, %v192_v31  ;;  %v363_v36 = vpack.c.bf16 %v195_v35, %v194_v34  ;;  %v196_v37 = vld [vmem:[#allocation4 + $0x30] sm:$0xff]  ;;  %v197_v38 = vld [vmem:[#allocation4 + $0x38] sm:$0xff]  ;;  %v198_v40 = vld [vmem:[#allocation4 + $0x40] sm:$0xff] }
  0x2a   :  { %v41_v8 = vadd.f32 %v40_v7, %v39_v6  ;;  %v366_v39 = vpack.c.bf16 %v197_v38, %v196_v37  ;;  %v199_v41 = vld [vmem:[#allocation4 + $0x48] sm:$0xff]  ;;  %v200_v43 = vld [vmem:[#allocation4 + $0x50] sm:$0xff]  ;;  %v307_v44 = vld [vmem:[#allocation4 + $0x5a] ss:$0 sm:$0xff] }
  0x2b   :  { %361 = vmatpush3.bf16.msra.mxu1 %v360_v33  ;;  %v369_v42 = vpack.c.bf16 %v199_v41, %v198_v40  ;;  %v310_v6 = vld [vmem:[#allocation4 + $0x5c] ss:$0 sm:$0xff] }
  0x2c   :  { %v42_v9 = vrot.slane %v41_v8, 2  ;;  %362 = vmatprep.subr.bf16.mxu1 %v435_v0 }
  0x2e   :  { %v43_v10 = vadd.f32 %v42_v9, %v41_v8 }
  0x2f   :  { %364 = vmatpush3.bf16.msra.mxu1 %v363_v36 }
  0x30   :  { %v44_v11 = vrot.slane %v43_v10, 1  ;;  %365 = vmatprep.subr.bf16.mxu1 %v435_v0 }
  0x32   :  { %v45_v12 = vadd.f32 %v44_v11, %v43_v10 }
  0x33   :  { %367 = vmatpush3.bf16.msra.mxu1 %v366_v39 }
  0x34   :  { %v46_v13 = vmul.f32 0.125, %v45_v12  ;;  %368 = vmatprep.subr.bf16.mxu1 %v435_v0  ;;  %v311_v12 = vld [vmem:[#allocation4 + $0x5d] ss:$0 sm:$0xff] }
  0x36   :  { %v47_v14 = vsub.f32 %v37_v4, %v46_v13  ;;  %v309_v4 = vld [vmem:[#allocation4 + $0x5b] ss:$0 sm:$0xff] }
  0x37   :  { %370 = vmatpush3.bf16.msra.mxu1 %v369_v42 }
  0x38   :  { %v48_v15 = vmul.f32 %v47_v14, %v47_v14  ;;  %351 = vmatprep.subr.mxu1 %v437_v1 }
  0x3a   :  { %v49_v16 = vsel %vm38_vm1, %v48_v15, 0.0 }
  0x3b   :  { %v50_v17 = vrot.slane %v49_v16, 4  ;;  %352 = vmatpush3.msra.mxu1 %v200_v43 }
  0x3d   :  { %v51_v18 = vadd.f32 %v50_v17, %v49_v16  ;;  %v313_v16 = vld [vmem:[#allocation4 + $0x5e] ss:$0 sm:$0xff] }
  0x3f   :  { %v52_v19 = vrot.slane %v51_v18, 2 }
  0x41   :  { %v53_v20 = vadd.f32 %v52_v19, %v51_v18 }
  0x43   :  { %v54_v21 = vrot.slane %v53_v20, 1 }
  0x45   :  { %v55_v22 = vadd.f32 %v54_v21, %v53_v20  ;;  %v314_v20 = vld [vmem:[#allocation4 + $0x5f] ss:$0 sm:$0xff] }
  0x47   :  { %v56_v23 = vmul.f32 0.125, %v55_v22 }
  0x49   :  { %v57_v24 = vadd.f32 1e-05, %v56_v23 }
  0x4b   :  { %379 = vrsqrt.f32 %v57_v24 }
  0x55   :  { %v380_v25 = vpop.eup %379 }
  0x56   :  { %v59_v27 = vmul.f32 %v380_v25, %v47_v14 }
  0x58   :  { %v65_v29 = vmul.f32 %v305_v26, %v59_v27 }
  0x5a   :  { %v71_v30 = vadd.f32 %v306_v28, %v65_v29 }
  0x5c   :  { %333 = vmatmul.mubr.msk.f32.vlgmr.msra.gmra.mrb[0].mxu0 %vm38_vm1, %v71_v30 }
  0x9a   :  { %v189_v9 = vpop.permute.xlu0 %188 }
 0x12f   :  { %v148_v45 = vpop.f32.mrb[0].mxu0 }
 0x130   :  { %v149_v46 = vadd.f32 %v307_v44, %v148_v45  ;;  %v334_v47 = vpop.f32.mrb[1].mxu0 }
 0x132   :  { %v153_v48 = vsel %vm152_vm2, %v149_v46, 0.0 }
 0x133   :  { %v154_v49 = vrot.slane %v153_v48, 4 }
 0x135   :  { %v155_v50 = vadd.f32 %v154_v49, %v153_v48 }
 0x137   :  { %v156_v51 = vrot.slane %v155_v50, 2 }
 0x139   :  { %v157_v52 = vadd.f32 %v156_v51, %v155_v50 }
 0x13b   :  { %v158_v53 = vrot.slane %v157_v52, 1 }
 0x13d   :  { %v159_v54 = vadd.f32 %v158_v53, %v157_v52 }
 0x13f   :  { %v160_v55 = vmul.f32 0.125, %v159_v54 }
 0x141   :  { %v161_v56 = vsub.f32 %v149_v46, %v160_v55 }
 0x143   :  { %v162_v57 = vmul.f32 %v161_v56, %v161_v56 }
 0x145   :  { %v163_v58 = vsel %vm152_vm2, %v162_v57, 0.0 }
 0x146   :  { %v164_v59 = vrot.slane %v163_v58, 4 }
 0x148   :  { %v165_v60 = vadd.f32 %v164_v59, %v163_v58 }
 0x14a   :  { %v166_v61 = vrot.slane %v165_v60, 2 }
 0x14c   :  { %v167_v62 = vadd.f32 %v166_v61, %v165_v60 }
 0x14e   :  { %v168_v63 = vrot.slane %v167_v62, 1 }
 0x150   :  { %v169_v0 = vadd.f32 %v168_v63, %v167_v62 }
 0x152   :  { %v170_v1 = vmul.f32 0.125, %v169_v0 }
 0x154   :  { %v171_v2 = vadd.f32 1e-05, %v170_v1 }
 0x156   :  { %381 = vrsqrt.f32 %v171_v2 }
 0x160   :  { %v382_v3 = vpop.eup %381 }
 0x161   :  { %v173_v5 = vmul.f32 %v382_v3, %v161_v56 }
 0x163   :  { %v179_v7 = vmul.f32 %v309_v4, %v173_v5 }
 0x165   :  { %v185_v8 = vadd.f32 %v310_v6, %v179_v7 }
 0x167   :  { %v186_v10 = vmax.f32 %v185_v8, 0.0 }
 0x169   :  { %v191_v11 = vsel %vm152_vm2, %v186_v10, %v189_v9 }
 0x16a   :  { %354 = vmatmul.mubr.msk.f32.vlgmr.msra.gmra.mrb[0].mxu1 %vm206_vm3, %v191_v11 }
 0x23d   :  { %v276_v13 = vpop.f32.mrb[0].mxu1 }
 0x23e   :  { %v277_v14 = vadd.f32 %v311_v12, %v276_v13  ;;  %v355_v15 = vpop.f32.mrb[1].mxu1 }
 0x240   :  { %v280_v17 = vmax.f32 %v277_v14, 0.0 }
 0x242   :  { %v286_v18 = vmul.f32 %v313_v16, %v280_v17 }
 0x244   :  { %v288_v19 = vsel %vm287_vm4, %v286_v18, 0.0 }
 0x245   :  { %289 = vadd.xlane.f32.xlu0 %v288_v19 }
 0x2d2   :  { %v290_v21 = vpop.xlane.xlu0 %289 }
 0x2d3   :  { %v296_v22 = vadd.f32 %v314_v20, %v290_v21 }
 0x2d5   :  { %298 = vst.msk [vmem:[%s496_s2] sm:$0xff] %vm297_vm5, %v296_v22 }
 0x2d6   :  { %303 = vsyncpa [#allocation3], 1 }
 0x2d7   :  { %304 = vsyncpa [#allocation5], 1 }

</bundles_post_ra>
